<compile_context>
chip_gen: v5e
topology: v5e:2x2
jax: 0.10.0
libtpu: 0.0.40
codegen_flags: <defaults>
</compile_context>

<pallas_src>
import functools

import jax
import jax.numpy as jnp
import numpy as np
from jax.experimental import pallas as pl
from jax.experimental.pallas import tpu as pltpu


# --------------------------------------------------------------------------------------
# One-time probe: pltpu.roll shift convention (+ whether bf16 rolls lower on this chip).
# --------------------------------------------------------------------------------------
@functools.lru_cache(maxsize=None)
def _probe_roll():
    """Returns (moves_up, roll_bf16_ok).

    moves_up == True  -> pltpu.roll follows the jnp.roll convention
                         (element i moves to index i+shift), so tap[j] = z[j+off]
                         is obtained with shift = (-off) % n.
    roll_bf16_ok      -> bf16 lane rolls lower natively; otherwise roll in f32 and
                         cast the im2col result once.
    """
    def run(dtype):
        def k(x_ref, o_ref):
            o_ref[...] = pltpu.roll(x_ref[...], 1, axis=1)
        x = jnp.broadcast_to(jnp.arange(128, dtype=jnp.float32), (16, 128)).astype(dtype)
        y = pl.pallas_call(k, out_shape=jax.ShapeDtypeStruct((16, 128), dtype))(x)
        return np.asarray(jax.block_until_ready(y)).astype(np.float32)

    try:
        y = run(jnp.bfloat16)
        bf16_ok = True
    except Exception:            # bf16 roll did not lower on this backend; fall back to f32
        y = run(jnp.float32)
        bf16_ok = False
    moves_up = bool(y[0, 1] == 0.0)
    return moves_up, bf16_ok


# --------------------------------------------------------------------------------------
# Kernel
# --------------------------------------------------------------------------------------
def _im2col(z, row_w, moves_up):
    """Stack the 9 3x3 taps of a row-major-flattened, 2-D zero-padded image slab.

    tap(dy,dx)[:, j] = z[:, j + dy*row_w + dx]; wrap-around from pltpu.roll only lands on
    border/padding columns, which are either re-zeroed by the interior mask (conv1) or
    discarded by the wrapper (conv2).
    """
    n = z.shape[-1]
    taps = []
    for dy in (-1, 0, 1):
        for dx in (-1, 0, 1):
            off = dy * row_w + dx
            if off == 0:
                taps.append(z)
            else:
                shift = ((-off) if moves_up else off) % n
                taps.append(pltpu.roll(z, shift, axis=1))     # XLU lane rotation
    return jnp.concatenate(taps, axis=0)                      # (9*C, n)


def _basic_block_kernel(xpad_ref, mask_ref, w1_ref, b1_ref, w2_ref, b2_ref, out_ref,
                        *, row_w, moves_up, roll_bf16):
    # xpad_ref : (C, S) f32  bb images, each (H+2,W+2) zero-padded and flattened row-major,
    #                        concatenated along lanes, zero tail to S (multiple of 128).
    #                        Serves both as conv1 input (cast to bf16) and f32 residual.
    # mask_ref : (1, S) f32  1.0 at true image pixels, 0.0 at padding / tail columns.
    # w1_ref   : (C, 9*C) bf16  conv1 taps with BN1 scale folded in;  b1_ref: (C,1) f32.
    # w2_ref   : (C, 9*C) bf16  conv2 taps with BN2 scale folded in;  b2_ref: (C,1) f32.
    # out_ref  : (C, S) f32  full slab; the wrapper extracts the interior pixels.
    x_f32 = xpad_ref[...]
    x_in = x_f32.astype(jnp.bfloat16) if roll_bf16 else x_f32

    # conv1 (+ folded BN1 scale) -> bias -> ReLU -> interior mask
    x1 = _im2col(x_in, row_w, moves_up).astype(jnp.bfloat16)          # (9C, S)
    acc1 = jnp.dot(w1_ref[...], x1, preferred_element_type=jnp.float32)
    z1 = jnp.maximum(acc1 + b1_ref[...], 0.0) * mask_ref[...]         # halo exactly zero
    z1c = z1.astype(jnp.bfloat16) if roll_bf16 else z1

    # conv2 (+ folded BN2 scale) -> bias -> +skip -> ReLU
    x2 = _im2col(z1c, row_w, moves_up).astype(jnp.bfloat16)           # (9C, S)
    acc2 = jnp.dot(w2_ref[...], x2, preferred_element_type=jnp.float32)
    out_ref[...] = jnp.maximum(acc2 + b2_ref[...] + x_f32, 0.0)


# --------------------------------------------------------------------------------------
# Wrapper
# --------------------------------------------------------------------------------------
def custom_basic_block(x_nchw, w1, g1, beta1, rm1, rv1,
                       w2, g2, beta2, rm2, rv2, eps=1e-5):
    """CustomBasicBlock forward (stride=1, downsample=None, eval-mode BN).

    x_nchw: (B, C, H, W) float32 in the PyTorch layout; returns the same layout.
    """
    B, C, H, W = x_nchw.shape
    assert w1.shape == (C, C, 3, 3) and w2.shape == (C, C, 3, 3), (
        "identity skip (downsample=None) requires inplanes == filters")

    Hp, Wp = H + 2, W + 2
    Pw = Hp * Wp                                   # per-image padded flat width

    # ---- fold eval-mode BN: scale into the conv weights, bias stays ----
    s1 = g1 / jnp.sqrt(rv1 + eps)
    b1 = beta1 - rm1 * s1
    s2 = g2 / jnp.sqrt(rv2 + eps)
    b2 = beta2 - rm2 * s2

    def fold(w, s):
        # (Cout, Cin, 3, 3) -> (Cout, 9*Cin), tap-major / channel-minor K (matches the
        # kernel's concatenation order); BN scale folded along Cout.
        wt = jnp.transpose(w * s[:, None, None, None], (0, 2, 3, 1))
        return wt.reshape(w.shape[0], 9 * w.shape[1]).astype(jnp.bfloat16)

    w1big, w2big = fold(w1, s1), fold(w2, s2)
    b1c = b1.reshape(C, 1).astype(jnp.float32)
    b2c = b2.reshape(C, 1).astype(jnp.float32)

    # ---- fold the batch into the lane axis: bb images per grid step ----
    bb = max(1, min(B, 2048 // Pw))                # target ~2k lanes per step
    steps = -(-B // bb)
    if B >= 2 and steps == 1:                      # keep >=2 steps so both v7x TCs get work
        bb = -(-B // 2)
        steps = -(-B // bb)
    S = -(-(bb * Pw) // 128) * 128                 # lane-dense slab width

    xp = jnp.pad(x_nchw.astype(jnp.float32),
                 ((0, steps * bb - B), (0, 0), (1, 1), (1, 1)))        # batch + 2-D zero pad
    xp = xp.reshape(steps, bb, C, Pw).transpose(0, 2, 1, 3).reshape(steps, C, bb * Pw)
    xp = jnp.pad(xp, ((0, 0), (0, 0), (0, S - bb * Pw)))               # (steps, C, S) f32

    # interior mask (same for every step): 1.0 at true image pixels only
    m2d = jnp.pad(jnp.ones((H, W), jnp.float32), ((1, 1), (1, 1))).reshape(Pw)
    mask = jnp.pad(jnp.tile(m2d, bb), (0, S - bb * Pw)).reshape(1, S)

    moves_up, roll_bf16 = _probe_roll()
    kernel = functools.partial(_basic_block_kernel, row_w=Wp,
                               moves_up=moves_up, roll_bf16=roll_bf16)

    out_slab = pl.pallas_call(
        kernel,
        out_shape=jax.ShapeDtypeStruct((steps, C, S), jnp.float32),
        grid_spec=pltpu.PrefetchScalarGridSpec(
            num_scalar_prefetch=0,
            grid=(steps,),
            in_specs=[
                pl.BlockSpec((None, C, S), lambda i: (i, 0, 0)),   # padded x (conv in + skip)
                pl.BlockSpec((1, S), lambda i: (0, 0)),            # interior mask (fetched once)
                pl.BlockSpec((C, 9 * C), lambda i: (0, 0)),        # w1 (fetched once)
                pl.BlockSpec((C, 1), lambda i: (0, 0)),            # b1
                pl.BlockSpec((C, 9 * C), lambda i: (0, 0)),        # w2
                pl.BlockSpec((C, 1), lambda i: (0, 0)),            # b2
            ],
            out_specs=pl.BlockSpec((None, C, S), lambda i: (i, 0, 0)),
        ),
        compiler_params=pltpu.CompilerParams(
            dimension_semantics=("parallel",)),
    )(xp, mask, w1big, b1c, w2big, b2c)

    # ---- unfold: (steps, C, S) slabs -> (B, C, H, W) interior pixels ----
    out = out_slab[:, :, :bb * Pw].reshape(steps, C, bb, Hp, Wp)
    out = out.transpose(0, 2, 1, 3, 4).reshape(steps * bb, C, Hp, Wp)
    return out[:B, :, 1:H + 1, 1:W + 1]


# ---------------------------- pure-JAX reference ----------------------------
def _reference(x_nchw, w1, g1, beta1, rm1, rv1, w2, g2, beta2, rm2, rv2, eps=1e-5):
    # Same math as the kernel (eval-mode BN folded into the weights, bf16 conv operands,
    # f32 accumulation, f32 skip path) expressed with lax.conv.
    s1 = g1 / jnp.sqrt(rv1 + eps)
    b1 = beta1 - rm1 * s1
    s2 = g2 / jnp.sqrt(rv2 + eps)
    b2 = beta2 - rm2 * s2
    w1f = (w1 * s1[:, None, None, None]).astype(jnp.bfloat16)
    w2f = (w2 * s2[:, None, None, None]).astype(jnp.bfloat16)
    xb = x_nchw.astype(jnp.bfloat16)

    def conv(x, w):
        return jax.lax.conv_general_dilated(
            x, w, window_strides=(1, 1), padding=((1, 1), (1, 1)),
            dimension_numbers=("NCHW", "OIHW", "NCHW"),
            preferred_element_type=jnp.float32)

    z = jnp.maximum(conv(xb, w1f) + b1[None, :, None, None], 0.0)
    z = conv(z.astype(jnp.bfloat16), w2f) + b2[None, :, None, None]
    return jnp.maximum(x_nchw + z, 0.0)


if __name__ == "__main__":
    key = jax.random.PRNGKey(0)
    B, C, H, W = 2, 32, 16, 16          # inplanes == filters == 32, stride=1
    ks = jax.random.split(key, 11)

    x = jax.random.normal(ks[0], (B, C, H, W), jnp.float32)        # PyTorch NCHW input
    w1 = jax.random.normal(ks[1], (C, C, 3, 3), jnp.float32) * 0.1
    g1 = 1.0 + 0.1 * jax.random.normal(ks[2], (C,), jnp.float32)
    beta1 = 0.1 * jax.random.normal(ks[3], (C,), jnp.float32)
    rm1 = 0.1 * jax.random.normal(ks[4], (C,), jnp.float32)
    rv1 = 0.5 + jnp.abs(jax.random.normal(ks[5], (C,), jnp.float32))
    w2 = jax.random.normal(ks[6], (C, C, 3, 3), jnp.float32) * 0.1
    g2 = 1.0 + 0.1 * jax.random.normal(ks[7], (C,), jnp.float32)
    beta2 = 0.1 * jax.random.normal(ks[8], (C,), jnp.float32)
    rm2 = 0.1 * jax.random.normal(ks[9], (C,), jnp.float32)
    rv2 = 0.5 + jnp.abs(jax.random.normal(ks[10], (C,), jnp.float32))

    out = custom_basic_block(x, w1, g1, beta1, rm1, rv1,
                             w2, g2, beta2, rm2, rv2)
    jax.block_until_ready(out)

    ref = _reference(x, w1, g1, beta1, rm1, rv1, w2, g2, beta2, rm2, rv2)
    # bf16 MXU operands -> compare against the bf16-matched reference; tolerance covers
    # bf16 rounding / f32 accumulation-order effects.
    np.testing.assert_allclose(np.asarray(out), np.asarray(ref),
                               rtol=2e-2, atol=2e-2)
    print("KERNEL_OK")
</pallas_src>

<mosaic_0001>
module attributes {stable_mosaic.version = 11 : i64} {
  func.func @k(%arg0: memref<16x128xbf16, #tpu.memory_space<vmem>>, %arg1: memref<16x128xbf16, #tpu.memory_space<vmem>>) attributes {dimension_semantics = [], scalar_prefetch = 0 : i64, scratch_operands = 0 : i64, tpu.core_type = #tpu.core_type<tc>} {
    %c0 = arith.constant 0 : index
    %c0_0 = arith.constant 0 : index
    %0 = vector.load %arg0[%c0, %c0_0] : memref<16x128xbf16, #tpu.memory_space<vmem>>, vector<16x128xbf16>
    %c1_i32 = arith.constant 1 : i32
    %1 = tpu.dynamic_rotate %0 by %c1_i32 dim 1 : vector<16x128xbf16>, i32 -> vector<16x128xbf16>
    %c0_1 = arith.constant 0 : index
    %c0_2 = arith.constant 0 : index
    %2 = vector.load %arg1[%c0_1, %c0_2] : memref<16x128xbf16, #tpu.memory_space<vmem>>, vector<16x128xbf16>
    tpu.vector_store %arg1[%c0_1, %c0_2], %1 {strides = array<i32>} : memref<16x128xbf16, #tpu.memory_space<vmem>>, vector<16x128xbf16>,
    return
  }
}

module attributes {stable_mosaic.version = 11 : i64} {
  func.func @k(%arg0: memref<16x128xf32, #tpu.memory_space<vmem>>, %arg1: memref<16x128xf32, #tpu.memory_space<vmem>>) attributes {dimension_semantics = [], scalar_prefetch = 0 : i64, scratch_operands = 0 : i64, tpu.core_type = #tpu.core_type<tc>} {
    %c0 = arith.constant 0 : index
    %c0_0 = arith.constant 0 : index
    %0 = vector.load %arg0[%c0, %c0_0] : memref<16x128xf32, #tpu.memory_space<vmem>>, vector<16x128xf32>
    %c1_i32 = arith.constant 1 : i32
    %1 = tpu.dynamic_rotate %0 by %c1_i32 dim 1 : vector<16x128xf32>, i32 -> vector<16x128xf32>
    %c0_1 = arith.constant 0 : index
    %c0_2 = arith.constant 0 : index
    %2 = vector.load %arg1[%c0_1, %c0_2] : memref<16x128xf32, #tpu.memory_space<vmem>>, vector<16x128xf32>
    tpu.vector_store %arg1[%c0_1, %c0_2], %1 {strides = array<i32>} : memref<16x128xf32, #tpu.memory_space<vmem>>, vector<16x128xf32>,
    return
  }
}

</mosaic_0001>

<bundles_post_ra>
// kernel: tpu_custom_call.1
= control target key start
LH: loop header
LB: loop body
LE: loop exit
PB: predicated region body
PF: predicated region fallthrough
CT: control target
= control target key end

     0   :  { %6 = vsyncpa [#allocation3], 0  ;;  %s130_s0 = inlined_call_operand.hbm [shape: f32[16,128], index: 0, kind: input, shape index: {}]   ;;  %s131_s1 = inlined_call_operand.hbm [shape: f32[16,128], index: 1, kind: output, shape index: {}]  }
   0x1   :  { %7 = vsyncpa [#allocation4], 0  ;;  %s12_s8 = sshll.u32 %s130_s0, 4  ;;  %s109_s9 = smov [#allocation2]   ;;  %s13_s8 = int_to_ptr.hbm [resolvable:$true] %s12_s8 }
   0x2   :  { %s14_s10 = sshll.u32 %s109_s9, 4  ;;  %s110_s11 = smov 128   ;;  %s15_s10 = int_to_ptr.vmem [resolvable:$true] %s14_s10 }
   0x3   :  { %s111_s12 = smov 8  }
   0x4   :  { %20 = dma.hbm_to_vmem [thread:$0]  %s13_s8, 256, %s15_s10, [#allocation3], %s110_s11, %s110_s11, %s111_s12  }
   0x5   :  { %105 = dma.done.wait [#allocation3], 256  }
   0x6   :  { %106 = vsyncadd [#allocation3], 4294967040  ;;  %v25_v0 = vld [vmem:[#allocation2] sm:$0xff]  ;;  %s112_s13 = smov 1   ;;  %v26_v1 = vld [vmem:[#allocation2 + $0x8] sm:$0xff]  ;;  %s113_s14 = smov [#allocation5]  }
   0x7   :  { %27 = vrot.lane.b32.xlu0 %v25_v0, %s112_s13  ;;  %s37_s15 = sshll.u32 %s113_s14, 4  ;;  %s39_s17 = sshll.u32 %s131_s1, 4  ;;  %s38_s15 = int_to_ptr.vmem [resolvable:$true] %s37_s15  ;;  %s40_s17 = int_to_ptr.hbm [resolvable:$true] %s39_s17 }
   0xf   :  { %29 = vrot.lane.b32.xlu0 %v26_v1, %s112_s13 }
  0x79   :  { %v28_v2 = vpop.permute.xlu0 %27 }
  0x7a   :  { %31 = vst [vmem:[#allocation5] sm:$0xff] %v28_v2 }
  0x81   :  { %v30_v3 = vpop.permute.xlu0 %29 }
  0x82   :  { %32 = vst [vmem:[#allocation5 + $0x8] sm:$0xff] %v30_v3 }
  0x83   :  { %45 = dma.vmem_to_hbm [thread:$0]  %s38_s15, 256, %s40_s17, [#allocation4], %s110_s11, %s110_s11, %s111_s12  }
  0x84   :  { %107 = dma.done.wait [#allocation4], 256  }
  0x85   :  { %108 = vsyncadd [#allocation4], 4294967040 }
  0x86   :  { %50 = vsyncpa [#allocation3], 1 }
  0x87   :  { %51 = vsyncpa [#allocation4], 1 }

</bundles_post_ra>
